<compile_context>
chip_gen: v6e
topology: v6e:2x2x1
jax: 0.10.0
libtpu: 0.0.40
codegen_flags: <defaults>
</compile_context>

<pallas_src>
import functools
import math

import jax
import jax.numpy as jnp
from jax.experimental import pallas as pl
from jax.experimental.pallas import tpu as pltpu


def make_pe(d_model: int, max_len: int = 5000, dtype=jnp.float32):
    """Sinusoidal positional-encoding table, shape [max_len, 1, d_model]."""
    assert d_model % 2 == 0, "make_pe requires an even d_model (same as the PyTorch recipe)"
    position = jnp.arange(max_len, dtype=jnp.float32)[:, None]                # (L, 1)
    div_term = jnp.exp(
        jnp.arange(0, d_model, 2, dtype=jnp.float32)
        * (-math.log(10000.0) / d_model)
    )                                                                         # (D/2,)
    angles = position * div_term                                              # (L, D/2)
    pe = jnp.zeros((max_len, d_model), dtype=jnp.float32)
    pe = pe.at[:, 0::2].set(jnp.sin(angles))
    pe = pe.at[:, 1::2].set(jnp.cos(angles))
    return pe[:, None, :].astype(dtype)                                       # (L, 1, D)


def _target_block_bytes():
    """Generation-aware (target tile bytes, explicit vmem_limit_bytes or None)."""
    try:
        kind = jax.devices()[0].device_kind.lower()
    except Exception:
        kind = ""
    if "v7" in kind:
        # 3.2 TB/s HBM: bigger blocks amortize the ~0.35 us/step overhead.
        # Double-buffered x + out + pe at 4 MiB tiles ~ 17 MiB -> bump scoped VMEM.
        return 4 * 1024 * 1024, 48 << 20
    # v5e/v6e: ~2 MiB blocks already sit near the HBM roofline and fit the
    # v5e 16 MiB scoped-VMEM default with double buffering.
    return 2 * 1024 * 1024, None


def _choose_seq_tile(S, B, D, itemsize, target_bytes):
    """Pick a sequence tile so one (Ts, B, D) block is ~target_bytes of *real* VMEM."""
    # B is the sublane (second-minor) axis, D the lane axis: account for padding.
    sublane = max(8, 8 * (4 // itemsize))        # 8 f32 / 16 bf16 / 32 int8
    padded_row_bytes = (pl.cdiv(B, sublane) * sublane) * (pl.cdiv(D, 128) * 128) * itemsize
    rows = max(1, target_bytes // padded_row_bytes)
    Ts = int(min(S, rows))

    # Guarantee multiple grid blocks for anything that isn't tiny, so the
    # double-buffer pipeline (and v7x's 2 TensorCores) are actually engaged.
    total_bytes = S * padded_row_bytes
    if total_bytes > 4 * target_bytes:
        Ts = min(Ts, pl.cdiv(S, 4))
    elif total_bytes > target_bytes:
        Ts = min(Ts, pl.cdiv(S, 2))
    Ts = max(1, int(Ts))

    # Prefer a Ts that divides S (no partial last block -> unmasked DMA/stores).
    if S % Ts != 0:
        for cand in range(Ts, max(Ts // 2, 0), -1):
            if S % cand == 0:
                Ts = cand
                break
    return Ts


def _pos_encoding_kernel(x_ref, pe_ref, o_ref):
    # Eval / p==0 path: out = x + pe (pe already cast to x.dtype in the wrapper).
    o_ref[...] = (x_ref[...] + pe_ref[...]).astype(o_ref.dtype)


def _pos_encoding_dropout_kernel(seed_ref, x_ref, pe_ref, o_ref, *, p: float):
    # Training path: fused inverted dropout.  Requires a real TPU backend
    # (pltpu.prng_* has no CPU/interpret lowering).
    y = x_ref[...] + pe_ref[...]

    # Per-tile seed: each grid block (possibly on a different TensorCore) gets
    # an independent, deterministic stream.
    pltpu.prng_seed(seed_ref[0] + pl.program_id(0))
    bits = pltpu.prng_random_bits(y.shape)
    if bits.dtype != jnp.uint32:                 # no-op if already uint32
        bits = pltpu.bitcast(bits, jnp.uint32)
    threshold = min(int(p * (1 << 32)), (1 << 32) - 1)
    keep = bits >= jnp.uint32(threshold)         # P(keep) = 1 - p
    scale = 1.0 / (1.0 - p)
    o_ref[...] = jnp.where(keep, y * scale, jnp.zeros_like(y)).astype(o_ref.dtype)


def positional_encoding(
    x: jax.Array,
    pe: jax.Array,
    *,
    dropout_p: float = 0.1,
    train: bool = False,
    seed: int = 0,
    seq_block: int | None = None,
    donate_x: bool = False,
) -> jax.Array:
    """x: [S, B, D]; pe: [max_len, 1, D].  Returns dropout(x + pe[:S])."""
    S, B, D = x.shape
    L = pe.shape[0]
    assert pe.shape == (L, 1, D) and L >= S, "pe table too short / wrong shape"
    assert 0.0 <= dropout_p <= 1.0, "dropout_p must be in [0, 1]"

    if train and dropout_p >= 1.0:
        # torch.nn.Dropout(p=1.0) zeros the whole tensor (avoid 1/(1-p) = inf).
        return jnp.zeros_like(x)

    pe = pe.astype(x.dtype)  # cast once in the wrapper, not per tile
    target_bytes, vmem_limit = _target_block_bytes()
    if seq_block is None:
        seq_block = _choose_seq_tile(S, B, D, jnp.dtype(x.dtype).itemsize, target_bytes)
    Ts = int(seq_block)
    grid = (pl.cdiv(S, Ts),)

    cp_kwargs = dict(dimension_semantics=("parallel",))
    if vmem_limit is not None:
        cp_kwargs["vmem_limit_bytes"] = int(vmem_limit)
    compiler_params = pltpu.CompilerParams(**cp_kwargs)

    use_dropout = bool(train) and dropout_p > 0.0
    if use_dropout:
        kernel = functools.partial(_pos_encoding_dropout_kernel, p=float(dropout_p))
        grid_spec = pltpu.PrefetchScalarGridSpec(
            num_scalar_prefetch=1,
            grid=grid,
            in_specs=[
                pl.BlockSpec((Ts, B, D), lambda i, seed_ref: (i, 0, 0)),  # x
                pl.BlockSpec((Ts, 1, D), lambda i, seed_ref: (i, 0, 0)),  # full pe table
            ],
            out_specs=pl.BlockSpec((Ts, B, D), lambda i, seed_ref: (i, 0, 0)),
        )
        operands = (jnp.asarray([seed], dtype=jnp.int32), x, pe)
        x_operand_index = 1  # flattened operand order is (seed, x, pe)
    else:
        kernel = _pos_encoding_kernel
        grid_spec = pltpu.PrefetchScalarGridSpec(
            num_scalar_prefetch=0,
            grid=grid,
            in_specs=[
                pl.BlockSpec((Ts, B, D), lambda i: (i, 0, 0)),  # x
                pl.BlockSpec((Ts, 1, D), lambda i: (i, 0, 0)),  # full pe table
            ],
            out_specs=pl.BlockSpec((Ts, B, D), lambda i: (i, 0, 0)),
        )
        operands = (x, pe)
        x_operand_index = 0  # flattened operand order is (x, pe)

    extra = {}
    if donate_x:
        # Alias x (its flattened operand index depends on whether the seed is
        # prefetched) onto output 0 for an in-place add.
        extra["input_output_aliases"] = {x_operand_index: 0}

    return pl.pallas_call(
        kernel,
        out_shape=jax.ShapeDtypeStruct((S, B, D), x.dtype),
        grid_spec=grid_spec,
        compiler_params=compiler_params,
        **extra,
    )(*operands)


if __name__ == "__main__":
    d_model = 32
    seq_len = 8
    batch = 2
    max_len = 64

    key = jax.random.PRNGKey(0)
    x = jax.random.normal(key, (seq_len, batch, d_model), dtype=jnp.float32)
    pe = make_pe(d_model, max_len=max_len)
    ref = x + pe[:seq_len]

    # --- eval mode (dropout is identity), matches the PyTorch module in .eval()
    out = jax.block_until_ready(positional_encoding(x, pe, dropout_p=0.1, train=False))
    assert out.shape == (seq_len, batch, d_model)
    assert jnp.allclose(out, ref, atol=1e-6), "eval-mode mismatch vs reference"

    # --- multi-block grid (partial last block) to exercise the tiled path
    S2 = 40
    x2 = jax.random.normal(jax.random.PRNGKey(1), (S2, batch, d_model), jnp.float32)
    out2 = jax.block_until_ready(
        positional_encoding(x2, pe, dropout_p=0.1, train=False, seq_block=16)
    )
    assert jnp.allclose(out2, x2 + pe[:S2], atol=1e-6), "tiled eval mismatch"

    # --- auto-chosen tile (exercises the divisor / multi-block sizing logic)
    out3 = jax.block_until_ready(positional_encoding(x2, pe, dropout_p=0.1, train=False))
    assert jnp.allclose(out3, x2 + pe[:S2], atol=1e-6), "auto-tile eval mismatch"

    # --- training mode: fused dropout uses the TPU hardware PRNG, which only
    #     lowers on a real TPU backend — skip it on CPU / interpret runs.
    if jax.devices()[0].platform == "tpu":
        p = 0.1
        out_t = jax.block_until_ready(
            positional_encoding(x, pe, dropout_p=p, train=True, seed=1234)
        )
        scale = 1.0 / (1.0 - p)
        valid = jnp.isclose(out_t, 0.0, atol=1e-6) | jnp.isclose(
            out_t, ref * scale, rtol=1e-5, atol=1e-5
        )
        assert bool(jnp.all(valid)), "dropout output must be 0 or scaled (x + pe)"
        keep_frac = float(jnp.mean((out_t != 0.0).astype(jnp.float32)))
        assert 0.5 < keep_frac <= 1.0, f"implausible dropout keep fraction {keep_frac}"

        # p = 1.0 must zero the tensor (PyTorch Dropout(p=1) semantics)
        out_z = jax.block_until_ready(
            positional_encoding(x, pe, dropout_p=1.0, train=True, seed=7)
        )
        assert bool(jnp.all(out_z == 0.0)), "p=1.0 dropout must produce zeros"

    print("KERNEL_OK")
</pallas_src>

<mosaic_0001>
module attributes {stable_mosaic.version = 11 : i64} {
  func.func @_pos_encoding_kernel(%arg0: i32, %arg1: memref<8x2x32xf32, #tpu.memory_space<vmem>>, %arg2: memref<8x1x32xf32, #tpu.memory_space<vmem>>, %arg3: memref<8x2x32xf32, #tpu.memory_space<vmem>>) attributes {dimension_semantics = [#tpu.dimension_semantics<parallel>], iteration_bounds = array<i64: 1>, scalar_prefetch = 0 : i64, scratch_operands = 0 : i64, tpu.core_type = #tpu.core_type<tc>, window_params = [{transform_indices = @transform_0, window_bounds = array<i64: 8, 2, 32>}, {transform_indices = @transform_1, window_bounds = array<i64: 8, 1, 32>}, {transform_indices = @transform_2, window_bounds = array<i64: 8, 2, 32>}]} {
    %c0 = arith.constant 0 : index
    %c0_0 = arith.constant 0 : index
    %c0_1 = arith.constant 0 : index
    %0 = vector.load %arg1[%c0, %c0_0, %c0_1] : memref<8x2x32xf32, #tpu.memory_space<vmem>>, vector<8x2x32xf32>
    %c0_2 = arith.constant 0 : index
    %c0_3 = arith.constant 0 : index
    %c0_4 = arith.constant 0 : index
    %1 = vector.load %arg2[%c0_2, %c0_3, %c0_4] : memref<8x1x32xf32, #tpu.memory_space<vmem>>, vector<8x1x32xf32>
    %2 = vector.broadcast %1 : vector<8x1x32xf32> to vector<8x2x32xf32>
    %3 = arith.addf %0, %2 : vector<8x2x32xf32>
    %c0_5 = arith.constant 0 : index
    %c0_6 = arith.constant 0 : index
    %c0_7 = arith.constant 0 : index
    %4 = vector.load %arg3[%c0_5, %c0_6, %c0_7] : memref<8x2x32xf32, #tpu.memory_space<vmem>>, vector<8x2x32xf32>
    tpu.vector_store %arg3[%c0_5, %c0_6, %c0_7], %3 {strides = array<i32>} : memref<8x2x32xf32, #tpu.memory_space<vmem>>, vector<8x2x32xf32>,
    return
  }
  func.func @transform_0(%arg0: i32) -> (i32, i32, i32) {
    %c0_i32 = arith.constant 0 : i32
    %c0_i32_0 = arith.constant 0 : i32
    %c0_i32_1 = arith.constant 0 : i32
    return %arg0, %c0_i32, %c0_i32_0 : i32, i32, i32
  }
  func.func @transform_1(%arg0: i32) -> (i32, i32, i32) {
    %c0_i32 = arith.constant 0 : i32
    %c0_i32_0 = arith.constant 0 : i32
    %c0_i32_1 = arith.constant 0 : i32
    return %arg0, %c0_i32, %c0_i32_0 : i32, i32, i32
  }
  func.func @transform_2(%arg0: i32) -> (i32, i32, i32) {
    %c0_i32 = arith.constant 0 : i32
    %c0_i32_0 = arith.constant 0 : i32
    %c0_i32_1 = arith.constant 0 : i32
    return %arg0, %c0_i32, %c0_i32_0 : i32, i32, i32
  }
}

</mosaic_0001>

<bundles_post_ra>
// kernel: tpu_custom_call.1
= control target key start
LH: loop header
LB: loop body
LE: loop exit
PB: predicated region body
PF: predicated region fallthrough
CT: control target
= control target key end

     0   :  { %vm84_vm0 = vcmask 254976   ;;  %s219_s0 = inlined_call_operand.vmem [shape: f32[8,2,32], index: 0, kind: input, shape index: {}]   ;;  %s220_s1 = inlined_call_operand.vmem [shape: f32[64,1,32], index: 1, kind: input, shape index: {}]   ;;  %s221_s2 = inlined_call_operand.hbm [shape: f32[8,2,32], index: 2, kind: output, shape index: {}]  }
   0x1   :  { %v12_v0 = vld [vmem:[%s219_s0] sm:$0x3]  ;;  %v13_v3 = vld [vmem:[%s219_s0 + $0x2] sm:$0x3]  ;;  %v14_v5 = vld [vmem:[%s219_s0 + $0x4] sm:$0x3] }
   0x2   :  { %v109_v1 = vld [vmem:[%s220_s1] ss:$0 sm:$0xff]  ;;  %v110_v4 = vld [vmem:[%s220_s1 + $0x1] ss:$0 sm:$0xff]  ;;  %v111_v7 = vld [vmem:[%s220_s1 + $0x2] ss:$0 sm:$0xff] }
   0x3   :  { %v76_v2 = vadd.f32 %v109_v1, %v12_v0  ;;  %v77_v6 = vadd.f32 %v110_v4, %v13_v3  ;;  %v15_v8 = vld [vmem:[%s219_s0 + $0x6] sm:$0x3]  ;;  %v112_v9 = vld [vmem:[%s220_s1 + $0x3] ss:$0 sm:$0xff]  ;;  %v78_v10 = vadd.f32 %v111_v7, %v14_v5  ;;  %v16_v12 = vld [vmem:[%s219_s0 + $0x8] sm:$0x3] }
   0x4   :  { %v79_v11 = vadd.f32 %v112_v9, %v15_v8  ;;  %v113_v13 = vld [vmem:[%s220_s1 + $0x4] ss:$0 sm:$0xff]  ;;  %v17_v14 = vld [vmem:[%s219_s0 + $0xa] sm:$0x3]  ;;  %v114_v16 = vld [vmem:[%s220_s1 + $0x5] ss:$0 sm:$0xff] }
   0x5   :  { %85 = vst.msk [vmem:[#allocation2] sm:$0x3] %vm84_vm0, %v76_v2  ;;  %86 = vst.msk [vmem:[#allocation2 + $0x2] sm:$0x3] %vm84_vm0, %v77_v6  ;;  %v80_v15 = vadd.f32 %v113_v13, %v16_v12  ;;  %v18_v17 = vld [vmem:[%s219_s0 + $0xc] sm:$0x3]  ;;  %v81_v19 = vadd.f32 %v114_v16, %v17_v14 }
   0x6   :  { %v115_v18 = vld [vmem:[%s220_s1 + $0x6] ss:$0 sm:$0xff]  ;;  %87 = vst.msk [vmem:[#allocation2 + $0x4] sm:$0x3] %vm84_vm0, %v78_v10  ;;  %88 = vst.msk [vmem:[#allocation2 + $0x6] sm:$0x3] %vm84_vm0, %v79_v11 }
   0x7   :  { %v82_v20 = vadd.f32 %v115_v18, %v18_v17  ;;  %v19_v21 = vld [vmem:[%s219_s0 + $0xe] sm:$0x3]  ;;  %v116_v22 = vld [vmem:[%s220_s1 + $0x7] ss:$0 sm:$0xff] }
   0x8   :  { %7 = vsyncpa [#allocation3], 0  ;;  %89 = vst.msk [vmem:[#allocation2 + $0x8] sm:$0x3] %vm84_vm0, %v80_v15  ;;  %v83_v23 = vadd.f32 %v116_v22, %v19_v21  ;;  %s142_s13 = smov [#allocation2]  }
   0x9   :  { %s98_s14 = sshll.u32 %s142_s13, 4  ;;  %90 = vst.msk [vmem:[#allocation2 + $0xa] sm:$0x3] %vm84_vm0, %v81_v19  ;;  %91 = vst.msk [vmem:[#allocation2 + $0xc] sm:$0x3] %vm84_vm0, %v82_v20  ;;  %s99_s14 = int_to_ptr.vmem [resolvable:$true] %s98_s14 }
   0xa   :  { %92 = vst.msk [vmem:[#allocation2 + $0xe] sm:$0x3] %vm84_vm0, %v83_v23  ;;  %s120_s15 = scalar_lea.vmem %s99_s14, 256  ;;  %p125_p1 = scmp.lt.s32.totalorder %s99_s14, %s99_s14 }
   0xb   :  { %p121_p0 = scmp.ne.s32.totalorder %s99_s14, %s120_s15  ;;  %p126_p2 = scmp.lt.s32.totalorder %s120_s15, %s120_s15 }
   0xd   :  { %p127_p3 = por %p126_p2, %p125_p1 }
   0xf   :  { %p128_p4 = pnand %p127_p3, %p121_p0 }
  0x11   :  { %131 = shalt.err (!%p128_p4)
}
  0x12   :  { %s143_s0 = smov 32   ;;  %s144_s1 = smov 2  }
  0x13   :  { %104 = dma.vmem_to_hbm [thread:$0]  %s99_s14, 256, %s221_s2, [#allocation3], %s143_s0, %s143_s0, %s144_s1  }
  0x14   :  { %140 = dma.done.wait [#allocation3], 256  }
  0x15   :  { %141 = vsyncadd [#allocation3], 4294967040 }
  0x16   :  { %108 = vsyncpa [#allocation3], 1 }

</bundles_post_ra>
